<compile_context>
chip_gen: v5e
topology: v5e:2x2
jax: 0.10.0
libtpu: 0.0.40
codegen_flags: <defaults>
</compile_context>

<pallas_src>
import jax
import jax.numpy as jnp
from jax.experimental import pallas as pl
from jax.experimental.pallas import tpu as pltpu

IN_DIM = 6
HIDDEN = 100
HIDDEN_P = 128   # hidden dim padded to a sublane multiple (pad rows are zeros)
OUT_DIM = 1


def _round_up(x, m):
    return (x + m - 1) // m * m


def mlp_kernel(x_ref, w1_ref, b1_ref, w2_ref, b2_ref, o_ref):
    # x_ref : [TB, IN]   f32   batch tile in native layout (partial last tile ok)
    # w1_ref: [Hp, IN]   bf16  resident across grid steps
    # b1_ref: [Hp, 1]    f32   resident
    # w2_ref: [OUT, Hp]  bf16  resident
    # b2_ref: [OUT]      f32   SMEM scalar
    # o_ref : [OUT, TB]  f32   lane-dense output tile
    x_bf = x_ref[...].astype(jnp.bfloat16)                 # in-kernel MXU-feed cast
    # hT = w1 @ x^T with the transpose folded into the MXU contraction (trans_b).
    h = jax.lax.dot_general(
        w1_ref[...], x_bf,
        dimension_numbers=(((1,), (1,)), ((), ())),
        preferred_element_type=jnp.float32)                # [Hp, TB] on the MXU
    h = jnp.maximum(h + b1_ref[...], 0.0)                  # bias + ReLU in f32 (VPU)
    y = jnp.dot(w2_ref[...], h.astype(jnp.bfloat16),
                preferred_element_type=jnp.float32)        # [OUT, TB] on the MXU
    o_ref[...] = y + b2_ref[0]


def prepare_params(w1, b1, w2, b2):
    """One-time parameter prep (run once, outside the per-forward path).

    PyTorch nn.Linear layout in: w1 [100,6], b1 [100], w2 [1,100], b2 [1].
    Pads HIDDEN 100->128 with zeros (relu(0)=0 and w2 pad cols are 0, so the
    result is exact) and hoists the bf16 MXU-feed casts out of the hot path.
    """
    w1p = jnp.pad(w1, ((0, HIDDEN_P - HIDDEN), (0, 0))).astype(jnp.bfloat16)
    b1p = jnp.pad(b1, (0, HIDDEN_P - HIDDEN)).astype(jnp.float32).reshape(HIDDEN_P, 1)
    w2p = jnp.pad(w2, ((0, 0), (0, HIDDEN_P - HIDDEN))).astype(jnp.bfloat16)
    b2p = b2.astype(jnp.float32)
    return w1p, b1p, w2p, b2p


def net_forward(x, w1p, b1p, w2p, b2p, *, tb=None):
    """x: [B, 6] f32 -> [B, 1] f32  (fc1 -> relu -> fc2); params from prepare_params."""
    B = x.shape[0]
    if tb is None:
        # Two maximal batch tiles: even split across v7x's 2 TCs; at most one
        # extra ~0.35us step on single-TC v5e/v6e. Cap keeps f32 [Hp, tb]
        # temporaries well inside v7x's 64 MiB VMEM.
        tb = min(_round_up(pl.cdiv(B, 2), 128), 16384)
    n_tiles = pl.cdiv(B, tb)

    y_t = pl.pallas_call(
        mlp_kernel,
        out_shape=jax.ShapeDtypeStruct((OUT_DIM, B), jnp.float32),
        grid=(n_tiles,),
        in_specs=[
            pl.BlockSpec((tb, IN_DIM), lambda i: (i, 0)),         # x tile, native layout
            pl.BlockSpec((HIDDEN_P, IN_DIM), lambda i: (0, 0)),   # w1 resident
            pl.BlockSpec((HIDDEN_P, 1), lambda i: (0, 0)),        # b1 resident
            pl.BlockSpec((OUT_DIM, HIDDEN_P), lambda i: (0, 0)),  # w2 resident
            pl.BlockSpec(memory_space=pltpu.MemorySpace.SMEM),    # b2 scalar in SMEM
        ],
        out_specs=pl.BlockSpec((OUT_DIM, tb), lambda i: (0, i)),  # lane-dense output
        compiler_params=pltpu.CompilerParams(
            dimension_semantics=("parallel",),                    # v7x: shard across 2 TCs
        ),
    )(x, w1p, b1p, w2p, b2p)

    # OUT_DIM == 1, so [1, B] -> [B, 1] is a pure reshape (no transpose/copy).
    return y_t.reshape(B, OUT_DIM)


def init_params(key):
    """Deterministic init matching PyTorch nn.Linear shapes/limits."""
    k1, k2, k3, k4 = jax.random.split(key, 4)
    lim1 = 1.0 / jnp.sqrt(jnp.float32(IN_DIM))
    lim2 = 1.0 / jnp.sqrt(jnp.float32(HIDDEN))
    w1 = jax.random.uniform(k1, (HIDDEN, IN_DIM), jnp.float32, -lim1, lim1)
    b1 = jax.random.uniform(k2, (HIDDEN,), jnp.float32, -lim1, lim1)
    w2 = jax.random.uniform(k3, (OUT_DIM, HIDDEN), jnp.float32, -lim2, lim2)
    b2 = jax.random.uniform(k4, (OUT_DIM,), jnp.float32, -lim2, lim2)
    return w1, b1, w2, b2


if __name__ == "__main__":
    key = jax.random.PRNGKey(0)
    kx, kp = jax.random.split(key)
    B = 1000  # non-multiple of the tile size: exercises Pallas partial-block masking
    x = jax.random.normal(kx, (B, IN_DIM), jnp.float32)
    w1, b1, w2, b2 = init_params(kp)
    w1p, b1p, w2p, b2p = prepare_params(w1, b1, w2, b2)   # one-time, outside hot path

    fwd = jax.jit(net_forward)
    out = jax.block_until_ready(fwd(x, w1p, b1p, w2p, b2p))   # tb=512, grid of 2 tiles
    assert out.shape == (B, OUT_DIM)

    # Reference 1: same bf16-feed / f32-accumulate math as the kernel (tight).
    xb = x.astype(jnp.bfloat16).astype(jnp.float32)
    w1b = w1.astype(jnp.bfloat16).astype(jnp.float32)
    w2b = w2.astype(jnp.bfloat16).astype(jnp.float32)
    h_ref = jnp.maximum(xb @ w1b.T + b1[None, :], 0.0)
    h_ref = h_ref.astype(jnp.bfloat16).astype(jnp.float32)
    ref_bf16 = h_ref @ w2b.T + b2[None, :]
    assert jnp.allclose(out, ref_bf16, atol=1e-3, rtol=1e-3), \
        float(jnp.max(jnp.abs(out - ref_bf16)))

    # Reference 2: pure-f32 module semantics (loose; bf16 quantization error).
    ref_f32 = jnp.maximum(x @ w1.T + b1[None, :], 0.0) @ w2.T + b2[None, :]
    assert jnp.allclose(out, ref_f32, atol=5e-2, rtol=5e-2), \
        float(jnp.max(jnp.abs(out - ref_f32)))

    print("KERNEL_OK")
</pallas_src>

<mosaic_0001>
module attributes {stable_mosaic.version = 11 : i64} {
  func.func @mlp_kernel(%arg0: i32, %arg1: memref<512x6xf32, #tpu.memory_space<vmem>>, %arg2: memref<128x6xbf16, #tpu.memory_space<vmem>>, %arg3: memref<128x1xf32, #tpu.memory_space<vmem>>, %arg4: memref<1x128xbf16, #tpu.memory_space<vmem>>, %arg5: memref<1xf32, #tpu.memory_space<smem>>, %arg6: memref<1x512xf32, #tpu.memory_space<vmem>>) attributes {dimension_semantics = [#tpu.dimension_semantics<parallel>], iteration_bounds = array<i64: 2>, scalar_prefetch = 0 : i64, scratch_operands = 0 : i64, tpu.core_type = #tpu.core_type<tc>, window_params = [{transform_indices = @transform_0, window_bounds = array<i64: 512, 6>}, {pipeline_mode = #tpu.pipeline_mode<synchronous>, transform_indices = @transform_1, window_bounds = array<i64: 128, 6>}, {pipeline_mode = #tpu.pipeline_mode<synchronous>, transform_indices = @transform_2, window_bounds = array<i64: 128, 1>}, {pipeline_mode = #tpu.pipeline_mode<synchronous>, transform_indices = @transform_3, window_bounds = array<i64: 1, 128>}, {transform_indices = @transform_4, window_bounds = array<i64: 1>}, {transform_indices = @transform_5, window_bounds = array<i64: 1, 512>}]} {
    %c0 = arith.constant 0 : index
    %c0_0 = arith.constant 0 : index
    %0 = vector.load %arg1[%c0, %c0_0] : memref<512x6xf32, #tpu.memory_space<vmem>>, vector<512x6xf32>
    %1 = arith.truncf %0 : vector<512x6xf32> to vector<512x6xbf16>
    %c0_1 = arith.constant 0 : index
    %c0_2 = arith.constant 0 : index
    %2 = vector.load %arg2[%c0_1, %c0_2] : memref<128x6xbf16, #tpu.memory_space<vmem>>, vector<128x6xbf16>
    %cst = arith.constant dense<0.000000e+00> : vector<128x512xf32>
    %3 = tpu.matmul %2, %1, %cst {dimension_numbers = #tpu.dot_dimension_numbers<[1], [1], [0], [0], [0, 0, 1, 0], [], []>} : vector<128x6xbf16>, vector<512x6xbf16>, vector<128x512xf32> -> vector<128x512xf32>
    %c0_3 = arith.constant 0 : index
    %c0_4 = arith.constant 0 : index
    %4 = vector.load %arg3[%c0_3, %c0_4] : memref<128x1xf32, #tpu.memory_space<vmem>>, vector<128x1xf32>
    %5 = vector.broadcast %4 : vector<128x1xf32> to vector<128x512xf32>
    %6 = arith.addf %3, %5 : vector<128x512xf32>
    %cst_5 = arith.constant 0.000000e+00 : f32
    %7 = vector.broadcast %cst_5 : f32 to vector<128x512xf32>
    %8 = arith.maximumf %6, %7 : vector<128x512xf32>
    %c0_6 = arith.constant 0 : index
    %c0_7 = arith.constant 0 : index
    %9 = vector.load %arg4[%c0_6, %c0_7] : memref<1x128xbf16, #tpu.memory_space<vmem>>, vector<1x128xbf16>
    %10 = arith.truncf %8 : vector<128x512xf32> to vector<128x512xbf16>
    %cst_8 = arith.constant dense<0.000000e+00> : vector<1x512xf32>
    %11 = tpu.matmul %9, %10, %cst_8 {dimension_numbers = #tpu.dot_dimension_numbers<[1], [0], [0], [1], [0, 0, 1, 1], [], []>} : vector<1x128xbf16>, vector<128x512xbf16>, vector<1x512xf32> -> vector<1x512xf32>
    %c0_9 = arith.constant 0 : index
    %12 = memref.load %arg5[%c0_9] : memref<1xf32, #tpu.memory_space<smem>>
    %13 = vector.broadcast %12 : f32 to vector<1x512xf32>
    %14 = arith.addf %11, %13 : vector<1x512xf32>
    %c0_10 = arith.constant 0 : index
    %c0_11 = arith.constant 0 : index
    %15 = vector.load %arg6[%c0_10, %c0_11] : memref<1x512xf32, #tpu.memory_space<vmem>>, vector<1x512xf32>
    tpu.vector_store %arg6[%c0_10, %c0_11], %14 {strides = array<i32>} : memref<1x512xf32, #tpu.memory_space<vmem>>, vector<1x512xf32>,
    return
  }
  func.func @transform_0(%arg0: i32) -> (i32, i32) {
    %c0_i32 = arith.constant 0 : i32
    %c0_i32_0 = arith.constant 0 : i32
    return %arg0, %c0_i32 : i32, i32
  }
  func.func @transform_1(%arg0: i32) -> (i32, i32) {
    %c0_i32 = arith.constant 0 : i32
    %c0_i32_0 = arith.constant 0 : i32
    %c0_i32_1 = arith.constant 0 : i32
    return %c0_i32, %c0_i32_0 : i32, i32
  }
  func.func @transform_2(%arg0: i32) -> (i32, i32) {
    %c0_i32 = arith.constant 0 : i32
    %c0_i32_0 = arith.constant 0 : i32
    %c0_i32_1 = arith.constant 0 : i32
    return %c0_i32, %c0_i32_0 : i32, i32
  }
  func.func @transform_3(%arg0: i32) -> (i32, i32) {
    %c0_i32 = arith.constant 0 : i32
    %c0_i32_0 = arith.constant 0 : i32
    %c0_i32_1 = arith.constant 0 : i32
    return %c0_i32, %c0_i32_0 : i32, i32
  }
  func.func @transform_4(%arg0: i32) -> i32 {
    %c0_i32 = arith.constant 0 : i32
    %c0_i32_0 = arith.constant 0 : i32
    return %c0_i32 : i32
  }
  func.func @transform_5(%arg0: i32) -> (i32, i32) {
    %c0_i32 = arith.constant 0 : i32
    %c0_i32_0 = arith.constant 0 : i32
    return %c0_i32, %arg0 : i32, i32
  }
}

</mosaic_0001>

<bundles_post_ra>
// kernel: net_forward.1
= control target key start
LH: loop header
LB: loop body
LE: loop exit
PB: predicated region body
PF: predicated region fallthrough
CT: control target
= control target key end

     0   :  { %s1720_s0 = inlined_call_operand.vmem [shape: f32[1000,6], index: 0, kind: input, shape index: {}]   ;;  %s1721_s1 = inlined_call_operand.vmem [shape: bf16[128,6], index: 1, kind: input, shape index: {}]   ;;  %s1722_s2 = inlined_call_operand.vmem [shape: f32[128,1], index: 2, kind: input, shape index: {}]   ;;  %s1723_s3 = inlined_call_operand.vmem [shape: bf16[1,128], index: 3, kind: input, shape index: {}]   ;;  %s1724_s4 = inlined_call_operand.<no memory space> [shape: f32[1], index: 4, kind: input, shape index: {}]   ;;  %s1725_s5 = inlined_call_operand.hbm [shape: f32[1,1000], index: 5, kind: output, shape index: {}]  }
   0x1   :  { %10 = sst [smem:[#allocation2]] %s1724_s4 }
   0x2   :  { %11 = vsyncpa [#allocation4], 0 }
   0x3   :  { %13 = vsyncpa [#allocation4 + $0x1], 0  ;;  %s1281_s20 = smov 0   ;;  %s1283_s21 = smov 0  }
   0x4   :  { %s1285_s22 = smov 0   ;;  %s1287_s23 = smov 0  }
   0x5 LB: > { %s1302_s4 = sadd.s32 4294967295, %s1245_s23   ;;  %s1057_s24 = sadd.s32 4294967294, %s1245_s23   ;;  %s1245_s23 = sphi %s1287_s23, %s1742_s23   ;;  %s1241_s22 = sphi %s1285_s22, %s1741_s22   ;;  %s1237_s21 = sphi %s1283_s21, %s1740_s21   ;;  %s1233_s20 = sphi %s1281_s20, %s1739_s20  }
   0x6   : > { %s1306_s25 = sadd.s32 1, %s1245_s23   ;;  %s136_s26 = sadd.s32 1, %s1241_s22 }
   0x7   : > { %s133_s27 = ssub.s32 %s1245_s23, %s1306_s25  ;;  %p146_p0 = scmp.ne.s32.totalorder %s1241_s22, %s1237_s21 }
   0x8   : > { %p134_p1 = scmp.eq.s32.totalorder %s133_s27, 0  ;;  %p147_p2 = scmp.eq.s32.totalorder %s1302_s4, 1 }
   0x9   : > { %p152_p3 = scmp.ne.s32.totalorder %s1237_s21, %s1233_s20  ;;  %p153_p4 = scmp.eq.s32.totalorder %s1057_s24, 1 }
   0xa   : > { %s1317_s28 = scalar_select %p134_p1, %s1241_s22, %s136_s26  }
   0xb   : > { %p1319_p5 = por %p147_p2, %p146_p0  ;;  %p1323_p6 = por %p153_p4, %p152_p3 }
   0xc   : > { %p1060_p7 = scmp.ge.s32.totalorder %s1245_s23, 1  ;;  %p200_p8 = scmp.lt.s32.totalorder %s1245_s23, 3 }
   0xe   : > { %p201_p9 = pnand %p1060_p7, %p200_p8 }
  0x10   : > { %204 = sbr.rel (%p201_p9) target bundleno = 528 (0x210), region = 40 }
  0x15   : > { %s1062_s6 = sshll.u32 %s1302_s4, 6  ;;  %vm495_vm0 = vcmask 48128   ;;  %v1247_v44 = vmov 0   ;;  %v373_v45 = vld [vmem:[%s1722_s2 + $0x70] sm:$0xff]  ;;  %v374_v61 = vld [vmem:[%s1722_s2 + $0x78] sm:$0xff]  ;;  %s909_s11 = sld [smem:[#allocation2]] }
  0x16   : > { %p237_p10 = scmp.lt.s32.totalorder %s1062_s6, 124  ;;  %1180 = vset.pattern.permute.xlu0 %v1247_v44  ;;  %1181 = vset.pattern.permute.xlu1 %v1247_v44  ;;  %s229_s12 = sand.u32 1, %s1237_s21   ;;  %vm970_vm1 = vcmask 1040384   ;;  %vm972_vm2 = vcmask 1042434   ;;  %vm974_vm3 = vcmask 1041408  }
  0x17   : > { %447 = vperm.xlu0 %1180, %v373_v45   ;;  %1182 = vset.pattern.permute.xlu2 %v1247_v44  ;;  %v372_v45 = vld [vmem:[%s1722_s2 + $0x68] sm:$0xff]  ;;  %s1061_s13 = sshll.u32 %s229_s12, 2  ;;  %s1129_s14 = sshll.u32 %s1302_s4, 2 }
  0x18   : > { %s1744_s6 = smov (!%p237_p10, %s1062_s6), 124  ;;  %s231_s17 = scalar_lea.vmem [#allocation3], %s1061_s13 }
  0x19   : > { %s1063_s7 = sshll.u32 %s1744_s6, 3  ;;  %s995_s18 = sshll.u32 %s231_s17, 4  ;;  %s996_s18 = int_to_ptr.vmem [resolvable:$true] %s995_s18 }
  0x1a   : > { %s1333_s10 = scalar_lea.vmem %s1720_s0, %s1063_s7  ;;  %s983_s4 = scalar_lea.sflag [#allocation4], %s229_s12 }
  0x1b   : > { %v261_v0 = vld [vmem:[%s1333_s10 + $0x70] sm:$0xff]  ;;  %v262_v1 = vld [vmem:[%s1333_s10 + $0x78] sm:$0xff]  ;;  %v259_v11 = vld [vmem:[%s1333_s10 + $0x60] sm:$0xff]  ;;  %s1203_s7 = scalar_lea.hbm %s1725_s5, 8 }
  0x1c   : > { %v277_v2 = vld [vmem:[%s1333_s10 + $0xf0] sm:$0xff]  ;;  %v318_v3 = vpack.c.bf16 %v262_v1, %v261_v0  ;;  %v278_v4 = vld [vmem:[%s1333_s10 + $0xf8] sm:$0xff]  ;;  %v260_v14 = vld [vmem:[%s1333_s10 + $0x68] sm:$0xff] }
  0x1d   : > { %v293_v5 = vld [vmem:[%s1333_s10 + $0x170] sm:$0xff]  ;;  %v294_v6 = vld [vmem:[%s1333_s10 + $0x178] sm:$0xff]  ;;  %v326_v7 = vpack.c.bf16 %v278_v4, %v277_v2  ;;  %v275_v15 = vld [vmem:[%s1333_s10 + $0xe0] sm:$0xff]  ;;  %v317_v23 = vpack.c.bf16 %v260_v14, %v259_v11 }
  0x1e   : > { %v334_v8 = vpack.c.bf16 %v294_v6, %v293_v5  ;;  %v309_v9 = vld [vmem:[%s1333_s10 + $0x1f0] sm:$0xff]  ;;  %v310_v10 = vld [vmem:[%s1333_s10 + $0x1f8] sm:$0xff]  ;;  %v542_v12 = vsel %vm495_vm0, %v318_v3, 0  ;;  %v276_v16 = vld [vmem:[%s1333_s10 + $0xe8] sm:$0xff] }
  0x1f   : > { %v342_v13 = vpack.c.bf16 %v310_v10, %v309_v9  ;;  %616 = vmatpush.bf16.xpose.msra.mxu0 %v542_v12  ;;  %v566_v17 = vsel %vm495_vm0, %v326_v7, 0  ;;  %v291_v19 = vld [vmem:[%s1333_s10 + $0x160] sm:$0xff]  ;;  %v292_v20 = vld [vmem:[%s1333_s10 + $0x168] sm:$0xff]  ;;  %v325_v25 = vpack.c.bf16 %v276_v16, %v275_v15  ;;  %v539_v28 = vsel %vm495_vm0, %v317_v23, 0  ;;  %v257_v31 = vld [vmem:[%s1333_s10 + $0x50] sm:$0xff]  ;;  %452 = vperm.xlu0 %1180, %v374_v61  }
  0x20   : > { %v590_v18 = vsel %vm495_vm0, %v334_v8, 0  ;;  %v307_v21 = vld [vmem:[%s1333_s10 + $0x1e0] sm:$0xff]  ;;  %665 = vmatpush.bf16.xpose.msra.mxu1 %v566_v17  ;;  %v308_v24 = vld [vmem:[%s1333_s10 + $0x1e8] sm:$0xff]  ;;  %v333_v26 = vpack.c.bf16 %v292_v20, %v291_v19  ;;  %v258_v32 = vld [vmem:[%s1333_s10 + $0x58] sm:$0xff] }
  0x21   : > { %714 = vmatpush.bf16.xpose.msra.mxu2 %v590_v18  ;;  %v614_v22 = vsel %vm495_vm0, %v342_v13, 0  ;;  %v341_v27 = vpack.c.bf16 %v308_v24, %v307_v21  ;;  %v563_v29 = vsel %vm495_vm0, %v325_v25, 0  ;;  %v273_v33 = vld [vmem:[%s1333_s10 + $0xd0] sm:$0xff]  ;;  %v274_v35 = vld [vmem:[%s1333_s10 + $0xd8] sm:$0xff]  ;;  %v316_v40 = vpack.c.bf16 %v258_v32, %v257_v31  ;;  %v255_v49 = vld [vmem:[%s1333_s10 + $0x40] sm:$0xff] }
  0x22   : > { %763 = vmatpush.bf16.xpose.msra.mxu3 %v614_v22  ;;  %v587_v30 = vsel %vm495_vm0, %v333_v26, 0  ;;  %v289_v36 = vld [vmem:[%s1333_s10 + $0x150] sm:$0xff]  ;;  %v290_v37 = vld [vmem:[%s1333_s10 + $0x158] sm:$0xff]  ;;  %v324_v41 = vpack.c.bf16 %v274_v35, %v273_v33  ;;  %v256_v50 = vld [vmem:[%s1333_s10 + $0x48] sm:$0xff] }
  0x23   : > { %v611_v34 = vsel %vm495_vm0, %v341_v27, 0  ;;  %v305_v38 = vld [vmem:[%s1333_s10 + $0x1d0] sm:$0xff]  ;;  %v306_v39 = vld [vmem:[%s1333_s10 + $0x1d8] sm:$0xff]  ;;  %v332_v42 = vpack.c.bf16 %v290_v37, %v289_v36  ;;  %v536_v46 = vsel %vm495_vm0, %v316_v40, 0  ;;  %v271_v51 = vld [vmem:[%s1333_s10 + $0xc0] sm:$0xff]  ;;  %v315_v58 = vpack.c.bf16 %v256_v50, %v255_v49 }
  0x24   : > { %v340_v43 = vpack.c.bf16 %v306_v39, %v305_v38  ;;  %v560_v47 = vsel %vm495_vm0, %v324_v41, 0  ;;  %v272_v53 = vld [vmem:[%s1333_s10 + $0xc8] sm:$0xff]  ;;  %v287_v54 = vld [vmem:[%s1333_s10 + $0x140] sm:$0xff]  ;;  %v253_v2 = vld [vmem:[%s1333_s10 + $0x30] sm:$0xff] }
  0x25   : > { %v584_v48 = vsel %vm495_vm0, %v332_v42, 0  ;;  %v288_v55 = vld [vmem:[%s1333_s10 + $0x148] sm:$0xff]  ;;  %v303_v56 = vld [vmem:[%s1333_s10 + $0x1c0] sm:$0xff]  ;;  %v323_v59 = vpack.c.bf16 %v272_v53, %v271_v51  ;;  %v533_v63 = vsel %vm495_vm0, %v315_v58, 0  ;;  %v254_v3 = vld [vmem:[%s1333_s10 + $0x38] sm:$0xff] }
  0x26   : > { %v608_v52 = vsel %vm495_vm0, %v340_v43, 0  ;;  %v304_v57 = vld [vmem:[%s1333_s10 + $0x1c8] sm:$0xff]  ;;  %v331_v60 = vpack.c.bf16 %v288_v55, %v287_v54  ;;  %v269_v4 = vld [vmem:[%s1333_s10 + $0xb0] sm:$0xff]  ;;  %v270_v6 = vld [vmem:[%s1333_s10 + $0xb8] sm:$0xff]  ;;  %v314_v11 = vpack.c.bf16 %v254_v3, %v253_v2 }
  0x27   : > { %617 = vmatpush.bf16.xpose.msra.mxu0 %v539_v28  ;;  %v339_v62 = vpack.c.bf16 %v304_v57, %v303_v56  ;;  %v557_v0 = vsel %vm495_vm0, %v323_v59, 0  ;;  %v285_v7 = vld [vmem:[%s1333_s10 + $0x130] sm:$0xff]  ;;  %v286_v8 = vld [vmem:[%s1333_s10 + $0x138] sm:$0xff]  ;;  %v322_v12 = vpack.c.bf16 %v270_v6, %v269_v4  ;;  %v367_v14 = vld [vmem:[%s1722_s2 + $0x40] sm:$0xff] }
  0x28   : > { %666 = vmatpush.bf16.xpose.msra.mxu1 %v563_v29  ;;  %v581_v1 = vsel %vm495_vm0, %v331_v60, 0  ;;  %v301_v9 = vld [vmem:[%s1333_s10 + $0x1b0] sm:$0xff]  ;;  %v302_v10 = vld [vmem:[%s1333_s10 + $0x1b8] sm:$0xff]  ;;  %v330_v13 = vpack.c.bf16 %v286_v8, %v285_v7  ;;  %v530_v16 = vsel %vm495_vm0, %v314_v11, 0  ;;  %417 = vperm.xlu0 %1180, %v367_v14   ;;  %v251_v19 = vld [vmem:[%s1333_s10 + $0x20] sm:$0xff] }
  0x29   : > { %715 = vmatpush.bf16.xpose.msra.mxu2 %v587_v30  ;;  %v605_v5 = vsel %vm495_vm0, %v339_v62, 0  ;;  %v338_v15 = vpack.c.bf16 %v302_v10, %v301_v9  ;;  %v554_v17 = vsel %vm495_vm0, %v322_v12, 0  ;;  %v252_v20 = vld [vmem:[%s1333_s10 + $0x28] sm:$0xff]  ;;  %v267_v21 = vld [vmem:[%s1333_s10 + $0xa0] sm:$0xff]  ;;  %v369_v30 = vld [vmem:[%s1722_s2 + $0x50] sm:$0xff] }
  0x2a   : > { %764 = vmatpush.bf16.xpose.msra.mxu3 %v611_v34  ;;  %v578_v18 = vsel %vm495_vm0, %v330_v13, 0  ;;  %v268_v23 = vld [vmem:[%s1333_s10 + $0xa8] sm:$0xff]  ;;  %v283_v24 = vld [vmem:[%s1333_s10 + $0x120] sm:$0xff]  ;;  %v313_v28 = vpack.c.bf16 %v252_v20, %v251_v19  ;;  %v366_v33 = vld [vmem:[%s1722_s2 + $0x38] sm:$0xff]  ;;  %427 = vperm.xlu2 %1182, %v369_v30  }
  0x2b   : > { %v602_v22 = vsel %vm495_vm0, %v338_v15, 0  ;;  %v284_v25 = vld [vmem:[%s1333_s10 + $0x128] sm:$0xff]  ;;  %v299_v26 = vld [vmem:[%s1333_s10 + $0x1a0] sm:$0xff]  ;;  %v321_v31 = vpack.c.bf16 %v268_v23, %v267_v21  ;;  %v249_v36 = vld [vmem:[%s1333_s10 + $0x10] sm:$0xff] }
  0x2c   : > { %v300_v27 = vld [vmem:[%s1333_s10 + $0x1a8] sm:$0xff]  ;;  %v371_v29 = vld [vmem:[%s1722_s2 + $0x60] sm:$0xff]  ;;  %v329_v32 = vpack.c.bf16 %v284_v25, %v283_v24  ;;  %v527_v35 = vsel %vm495_vm0, %v313_v28, 0  ;;  %v250_v39 = vld [vmem:[%s1333_s10 + $0x18] sm:$0xff] }
  0x2d   : > { %437 = vperm.xlu1 %1181, %v371_v29   ;;  %v337_v34 = vpack.c.bf16 %v300_v27, %v299_v26  ;;  %v551_v37 = vsel %vm495_vm0, %v321_v31, 0  ;;  %v265_v40 = vld [vmem:[%s1333_s10 + $0x90] sm:$0xff]  ;;  %v266_v41 = vld [vmem:[%s1333_s10 + $0x98] sm:$0xff]  ;;  %v247_v56 = vld [vmem:[%s1333_s10] sm:$0xff] }
  0x2e   : > { %v575_v38 = vsel %vm495_vm0, %v329_v32, 0  ;;  %v281_v43 = vld [vmem:[%s1333_s10 + $0x110] sm:$0xff]  ;;  %v282_v44 = vld [vmem:[%s1333_s10 + $0x118] sm:$0xff]  ;;  %v320_v49 = vpack.c.bf16 %v266_v41, %v265_v40  ;;  %v248_v57 = vld [vmem:[%s1333_s10 + $0x8] sm:$0xff] }
  0x2f   : > { %618 = vmatpush.bf16.xpose.msra.mxu0 %v536_v46  ;;  %v599_v42 = vsel %vm495_vm0, %v337_v34, 0  ;;  %v297_v46 = vld [vmem:[%s1333_s10 + $0x190] sm:$0xff]  ;;  %v328_v50 = vpack.c.bf16 %v282_v44, %v281_v43  ;;  %v263_v58 = vld [vmem:[%s1333_s10 + $0x80] sm:$0xff]  ;;  %v264_v60 = vld [vmem:[%s1333_s10 + $0x88] sm:$0xff] }
  0x30   : > { %667 = vmatpush.bf16.xpose.msra.mxu1 %v560_v47  ;;  %412 = vperm.xlu0 %1180, %v366_v33   ;;  %v298_v47 = vld [vmem:[%s1333_s10 + $0x198] sm:$0xff]  ;;  %v361_v51 = vld [vmem:[%s1722_s2 + $0x10] sm:$0xff]  ;;  %v548_v54 = vsel %vm495_vm0, %v320_v49, 0  ;;  %v279_v61 = vld [vmem:[%s1333_s10 + $0x100] sm:$0xff]  ;;  %v319_v4 = vpack.c.bf16 %v264_v60, %v263_v58 }
  0x31   : > { %716 = vmatpush.bf16.xpose.msra.mxu2 %v584_v48  ;;  %v312_v48 = vpack.c.bf16 %v250_v39, %v249_v36  ;;  %v572_v55 = vsel %vm495_vm0, %v328_v50, 0  ;;  %v280_v62 = vld [vmem:[%s1333_s10 + $0x108] sm:$0xff]  ;;  %v370_v2 = vld [vmem:[%s1722_s2 + $0x58] sm:$0xff]  ;;  %v365_v12 = vld [vmem:[%s1722_s2 + $0x30] sm:$0xff] }
  0x32   : > { %765 = vmatpush.bf16.xpose.msra.mxu3 %v608_v52  ;;  %v336_v52 = vpack.c.bf16 %v298_v47, %v297_v46  ;;  %v368_v3 = vld [vmem:[%s1722_s2 + $0x48] sm:$0xff]  ;;  %432 = vperm.xlu2 %1182, %v370_v2   ;;  %v545_v9 = vsel %vm495_vm0, %v319_v4, 0  ;;  %v363_v13 = vld [vmem:[%s1722_s2 + $0x20] sm:$0xff]  ;;  %v1134_v19 = vld [vmem:[%s1721_s1 + $0x10] sm:$0xff] }
  0x33   : > { %v524_v53 = vsel %vm495_vm0, %v312_v48, 0  ;;  %v360_v6 = vld [vmem:[%s1722_s2 + $0x8] sm:$0xff]  ;;  %v1132_v14 = vld [vmem:[%s1721_s1] sm:$0xff]  ;;  %v1135_v20 = vld [vmem:[%s1721_s1 + $0x18] sm:$0xff] }
  0x34   : > { %v596_v59 = vsel %vm495_vm0, %v336_v52, 0  ;;  %v364_v15 = vld [vmem:[%s1722_s2 + $0x28] sm:$0xff]  ;;  %v1136_v21 = vld [vmem:[%s1721_s1 + $0x20] sm:$0xff]  ;;  %v1138_v26 = vld [vmem:[%s1721_s1 + $0x30] sm:$0xff] }
  0x35   : > { %442 = vperm.xlu1 %1181, %v372_v45   ;;  %v1139_v30 = vld [vmem:[%s1721_s1 + $0x38] sm:$0xff] }
  0x37   : > { %619 = vmatpush.bf16.xpose.msra.mxu0 %v533_v63  ;;  %v295_v63 = vld [vmem:[%s1333_s10 + $0x180] sm:$0xff] }
  0x38   : > { %668 = vmatpush.bf16.xpose.msra.mxu1 %v557_v0  ;;  %387 = vperm.xlu0 %1180, %v361_v51   ;;  %v296_v0 = vld [vmem:[%s1333_s10 + $0x188] sm:$0xff]  ;;  %s993_s10 = scalar_lea.hbm %s1725_s5, %s1129_s14 }
  0x39   : > { %717 = vmatpush.bf16.xpose.msra.mxu2 %v581_v1  ;;  %v311_v1 = vpack.c.bf16 %v248_v57, %v247_v56  ;;  %v335_v7 = vpack.c.bf16 %v296_v0, %v295_v63  ;;  %s997_s19 = sshll.u32 %s993_s10, 4  ;;  %s998_s19 = int_to_ptr.hbm [resolvable:$true] %s997_s19 }
  0x3a   : > { %766 = vmatpush.bf16.xpose.msra.mxu3 %v605_v5  ;;  %v327_v5 = vpack.c.bf16 %v280_v62, %v279_v61  ;;  %407 = vperm.xlu2 %1182, %v365_v12   ;;  %s1197_s24 = sshra.s32 %s998_s19, 4  ;;  %s1198_s24 = int_to_ptr.hbm [resolvable:$true] %s1197_s24 }
  0x3b   : > { %v521_v8 = vsel %vm495_vm0, %v311_v1, 0  ;;  %v593_v11 = vsel %vm495_vm0, %v335_v7, 0  ;;  %s1199_s26 = scalar_lea.hbm %s1198_s24, 4  ;;  %p1204_p0 = scmp.lt.s32.totalorder %s1198_s24, %s1725_s5 }
  0x3c   : > { %v569_v10 = vsel %vm495_vm0, %v327_v5, 0  ;;  %p1200_p11 = scmp.ne.s32.totalorder %s1198_s24, %s1199_s26  ;;  %p1205_p1 = scmp.lt.s32.totalorder %s1203_s7, %s1199_s26 }
  0x3d   : > { %422 = vperm.xlu1 %1181, %v368_v3  }
  0x3e   : > { %p1201_p12 = pnand %p1200_p11, %p1319_p5  ;;  %p1206_p2 = por %p1205_p1, %p1204_p0 }
  0x3f   : > { %620 = vmatpush.bf16.xpose.msra.mxu0 %v530_v16  ;;  %v362_v16 = vld [vmem:[%s1722_s2 + $0x18] sm:$0xff] }
  0x40   : > { %669 = vmatpush.bf16.xpose.msra.mxu1 %v554_v17  ;;  %382 = vperm.xlu0 %1180, %v360_v6   ;;  %v359_v17 = vld [vmem:[%s1722_s2] sm:$0xff]  ;;  %p1202_p13 = pneg %p1201_p12 }
  0x41   : > { %718 = vmatpush.bf16.xpose.msra.mxu2 %v578_v18  ;;  %v1133_v18 = vld [vmem:[%s1721_s1 + $0x8] sm:$0xff] }
  0x42   : > { %767 = vmatpush.bf16.xpose.msra.mxu3 %v602_v22  ;;  %402 = vperm.xlu2 %1182, %v364_v15   ;;  %v1137_v22 = vld [vmem:[%s1721_s1 + $0x28] sm:$0xff]  ;;  %p1207_p3 = pnand %p1206_p2, %p1202_p13 }
  0x45   : > { %397 = vperm.xlu1 %1181, %v363_v13  }
  0x47   : > { %621 = vmatpush.bf16.xpose.msra.mxu0 %v527_v35 }
  0x48   : > { %670 = vmatpush.bf16.xpose.msra.mxu1 %v551_v37 }
  0x49   : > { %719 = vmatpush.bf16.xpose.msra.mxu2 %v575_v38 }
  0x4a   : > { %768 = vmatpush.bf16.xpose.msra.mxu3 %v599_v42  ;;  %377 = vperm.xlu2 %1182, %v359_v17  }
  0x4d   : > { %392 = vperm.xlu1 %1181, %v362_v16  }
  0x4f   : > { %622 = vmatpush.bf16.xpose.msra.mxu0 %v524_v53 }
  0x50   : > { %671 = vmatpush.bf16.xpose.msra.mxu1 %v548_v54 }
  0x51   : > { %720 = vmatpush.bf16.xpose.msra.mxu2 %v572_v55 }
  0x52   : > { %769 = vmatpush.bf16.xpose.msra.mxu3 %v596_v59 }
  0x57   : > { %623 = vmatpush.bf16.xpose.msra.mxu0 %v521_v8 }
  0x58   : > { %672 = vmatpush.bf16.xpose.msra.mxu1 %v545_v9 }
  0x59   : > { %721 = vmatpush.bf16.xpose.msra.mxu2 %v569_v10 }
  0x5a   : > { %770 = vmatpush.bf16.xpose.msra.mxu3 %v593_v11 }
  0x5e   : > { %1096 = vmatmul.msk.bf16.vlgmr.msra.gmra.mxu0 %vm495_vm0, %v1132_v14 }
  0x5f   : > { %1104 = vmatmul.msk.bf16.vlgmr.msra.gmra.mxu1 %vm495_vm0, %v1132_v14 }
  0x60   : > { %1112 = vmatmul.msk.bf16.vlgmr.msra.gmra.mxu2 %vm495_vm0, %v1132_v14 }
  0x61   : > { %1120 = vmatmul.msk.bf16.vlgmr.msra.gmra.mxu3 %vm495_vm0, %v1132_v14 }
  0x6e   : > { %1097 = vmatmul.msk.bf16.gmra.mxu0 %vm495_vm0, %v1133_v18 }
  0x6f   : > { %1105 = vmatmul.msk.bf16.gmra.mxu1 %vm495_vm0, %v1133_v18 }
  0x70   : > { %1113 = vmatmul.msk.bf16.gmra.mxu2 %vm495_vm0, %v1133_v18 }
  0x71   : > { %1121 = vmatmul.msk.bf16.gmra.mxu3 %vm495_vm0, %v1133_v18 }
  0x7e   : > { %1098 = vmatmul.msk.bf16.gmra.mxu0 %vm495_vm0, %v1134_v19 }
  0x7f   : > { %1106 = vmatmul.msk.bf16.gmra.mxu1 %vm495_vm0, %v1134_v19 }
  0x80   : > { %1114 = vmatmul.msk.bf16.gmra.mxu2 %vm495_vm0, %v1134_v19 }
  0x81   : > { %1122 = vmatmul.msk.bf16.gmra.mxu3 %vm495_vm0, %v1134_v19 }
  0x84   : > { %v1523_v24 = vpop.permute.xlu2 %427 }
  0x89   : > { %v1520_v23 = vpop.permute.xlu0 %447 }
  0x8c   : > { %v1534_v27 = vpop.permute.xlu2 %432 }
  0x8e   : > { %1099 = vmatmul.msk.bf16.gmra.mxu0 %vm495_vm0, %v1135_v20 }
  0x8f   : > { %1107 = vmatmul.msk.bf16.gmra.mxu1 %vm495_vm0, %v1135_v20 }
  0x90   : > { %1115 = vmatmul.msk.bf16.gmra.mxu2 %vm495_vm0, %v1135_v20 }
  0x91   : > { %1123 = vmatmul.msk.bf16.gmra.mxu3 %vm495_vm0, %v1135_v20  ;;  %v1525_v25 = vpop.permute.xlu0 %452 }
  0x94   : > { %v1543_v31 = vpop.permute.xlu2 %407 }
  0x9a   : > { %v1536_v28 = vpop.permute.xlu0 %417 }
  0x9c   : > { %v1553_v34 = vpop.permute.xlu2 %402 }
  0x9e   : > { %1100 = vmatmul.msk.bf16.gmra.mxu0 %vm495_vm0, %v1136_v21 }
  0x9f   : > { %1108 = vmatmul.msk.bf16.gmra.mxu1 %vm495_vm0, %v1136_v21  ;;  %v1538_v29 = vpop.permute.xlu1 %437 }
  0xa0   : > { %1116 = vmatmul.msk.bf16.gmra.mxu2 %vm495_vm0, %v1136_v21 }
  0xa1   : > { %1124 = vmatmul.msk.bf16.gmra.mxu3 %vm495_vm0, %v1136_v21 }
  0xa2   : > { %v1545_v32 = vpop.permute.xlu0 %412 }
  0xa4   : > { %v378_v39 = vpop.permute.xlu2 %377 }
  0xa7   : > { %v1551_v33 = vpop.permute.xlu1 %442 }
  0xaa   : > { %v388_v35 = vpop.permute.xlu0 %387 }
  0xae   : > { %1101 = vmatmul.msk.bf16.gmra.mxu0 %vm495_vm0, %v1137_v22 }
  0xaf   : > { %1109 = vmatmul.msk.bf16.gmra.mxu1 %vm495_vm0, %v1137_v22  ;;  %v1555_v38 = vpop.permute.xlu1 %422 }
  0xb0   : > { %1117 = vmatmul.msk.bf16.gmra.mxu2 %vm495_vm0, %v1137_v22 }
  0xb1   : > { %1125 = vmatmul.msk.bf16.gmra.mxu3 %vm495_vm0, %v1137_v22 }
  0xb2   : > { %v383_v42 = vpop.permute.xlu0 %382 }
  0xb7   : > { %v398_v52 = vpop.permute.xlu1 %397 }
  0xbe   : > { %1102 = vmatmul.msk.bf16.gmra.mxu0 %vm495_vm0, %v1138_v26 }
  0xbf   : > { %1110 = vmatmul.msk.bf16.gmra.mxu1 %vm495_vm0, %v1138_v26  ;;  %v393_v8 = vpop.permute.xlu1 %392 }
  0xc0   : > { %1118 = vmatmul.msk.bf16.gmra.mxu2 %vm495_vm0, %v1138_v26 }
  0xc1   : > { %1126 = vmatmul.msk.bf16.gmra.mxu3 %vm495_vm0, %v1138_v26 }
  0xce   : > { %1103 = vmatmul.msk.bf16.gmra.mxu0 %vm495_vm0, %v1139_v30 }
  0xcf   : > { %1111 = vmatmul.msk.bf16.gmra.mxu1 %vm495_vm0, %v1139_v30 }
  0xd0   : > { %1119 = vmatmul.msk.bf16.gmra.mxu2 %vm495_vm0, %v1139_v30 }
  0xd1   : > { %1127 = vmatmul.msk.bf16.gmra.mxu3 %vm495_vm0, %v1139_v30 }
  0xdb   : > { %v625_v36 = vpop.f32.mrf.mxu0 }
  0xdc   : > { %v674_v37 = vpop.f32.mrf.mxu1  ;;  %v626_v40 = vadd.f32 %v625_v36, %v378_v39 }
  0xdd   : > { %v675_v41 = vadd.f32 %v674_v37, %v378_v39 }
  0xde   : > { %v812_v48 = vmax.f32 %v626_v40, 0.0 }
  0xdf   : > { %v813_v50 = vmax.f32 %v675_v41, 0.0 }
  0xe3   : > { %v723_v43 = vpop.f32.mrf.mxu2  ;;  %v627_v45 = vpop.f32.mrf.mxu0 }
  0xe4   : > { %v772_v44 = vpop.f32.mrf.mxu3  ;;  %v676_v46 = vpop.f32.mrf.mxu1  ;;  %v628_v47 = vadd.f32 %v627_v45, %v383_v42  ;;  %v724_v55 = vadd.f32 %v723_v43, %v378_v39 }
  0xe5   : > { %v677_v49 = vadd.f32 %v676_v46, %v383_v42  ;;  %v773_v57 = vadd.f32 %v772_v44, %v378_v39 }
  0xe6   : > { %v816_v51 = vmax.f32 %v628_v47, 0.0  ;;  %v814_v0 = vmax.f32 %v724_v55, 0.0 }
  0xe7   : > { %v817_v53 = vmax.f32 %v677_v49, 0.0  ;;  %v815_v2 = vmax.f32 %v773_v57, 0.0 }
  0xe8   : > { %v1557_v54 = vpack.c.bf16 %v816_v51, %v812_v48 }
  0xe9   : > { %v1559_v56 = vpack.c.bf16 %v817_v53, %v813_v50 }
  0xeb   : > { %1728 = vst [vmem:[#allocation6_spill] sm:$0xff] %v1559_v56  ;;  %v725_v58 = vpop.f32.mrf.mxu2  ;;  %v630_v61 = vpop.f32.mrf.mxu0 }
  0xec   : > { %v726_v59 = vadd.f32 %v725_v58, %v383_v42  ;;  %v774_v60 = vpop.f32.mrf.mxu3  ;;  %v679_v63 = vpop.f32.mrf.mxu1  ;;  %v631_v5 = vadd.f32 %v630_v61, %v388_v35 }
  0xed   : > { %v775_v62 = vadd.f32 %v774_v60, %v383_v42  ;;  %v680_v7 = vadd.f32 %v679_v63, %v388_v35 }
  0xee   : > { %v818_v1 = vmax.f32 %v726_v59, 0.0  ;;  %v820_v12 = vmax.f32 %v631_v5, 0.0 }
  0xef   : > { %v819_v3 = vmax.f32 %v775_v62, 0.0  ;;  %v821_v15 = vmax.f32 %v680_v7, 0.0 }
  0xf0   : > { %v1561_v4 = vpack.c.bf16 %v818_v1, %v814_v0 }
  0xf1   : > { %v1563_v6 = vpack.c.bf16 %v819_v3, %v815_v2 }
  0xf2   : > { %1729 = vst [vmem:[#allocation7_spill] sm:$0xff] %v1561_v4 }
  0xf3   : > { %1730 = vst [vmem:[#allocation8_spill] sm:$0xff] %v1563_v6  ;;  %v728_v9 = vpop.f32.mrf.mxu2  ;;  %v632_v11 = vpop.f32.mrf.mxu0 }
  0xf4   : > { %v777_v10 = vpop.f32.mrf.mxu3  ;;  %v681_v13 = vpop.f32.mrf.mxu1  ;;  %v633_v14 = vadd.f32 %v632_v11, %v393_v8  ;;  %v729_v20 = vadd.f32 %v728_v9, %v388_v35 }
  0xf5   : > { %v682_v16 = vadd.f32 %v681_v13, %v393_v8  ;;  %v778_v22 = vadd.f32 %v777_v10, %v388_v35 }
  0xf6   : > { %v824_v17 = vmax.f32 %v633_v14, 0.0  ;;  %v822_v41 = vmax.f32 %v729_v20, 0.0 }
  0xf7   : > { %v825_v18 = vmax.f32 %v682_v16, 0.0  ;;  %v823_v43 = vmax.f32 %v778_v22, 0.0 }
  0xf8   : > { %v1565_v19 = vpack.c.bf16 %v824_v17, %v820_v12 }
  0xf9   : > { %v1567_v21 = vpack.c.bf16 %v825_v18, %v821_v15 }
  0xfb   : > { %v730_v26 = vpop.f32.mrf.mxu2  ;;  %v635_v37 = vpop.f32.mrf.mxu0 }
  0xfc   : > { %v731_v30 = vadd.f32 %v730_v26, %v393_v8  ;;  %v779_v36 = vpop.f32.mrf.mxu3  ;;  %v684_v40 = vpop.f32.mrf.mxu1  ;;  %v636_v46 = vadd.f32 %v635_v37, %v398_v52 }
  0xfd   : > { %v780_v39 = vadd.f32 %v779_v36, %v393_v8  ;;  %v685_v48 = vadd.f32 %v684_v40, %v398_v52 }
  0xfe   : > { %v826_v42 = vmax.f32 %v731_v30, 0.0  ;;  %v828_v35 = vmax.f32 %v636_v46, 0.0 }
  0xff   : > { %v827_v44 = vmax.f32 %v780_v39, 0.0  ;;  %v829_v57 = vmax.f32 %v685_v48, 0.0 }
 0x100   : > { %v1569_v45 = vpack.c.bf16 %v826_v42, %v822_v41 }
 0x101   : > { %v1571_v47 = vpack.c.bf16 %v827_v44, %v823_v43 }
 0x102   : > { %1731 = vst [vmem:[#allocation9_spill] sm:$0xff] %v1569_v45 }
 0x103   : > { %1732 = vst [vmem:[#allocation10_spill] sm:$0xff] %v1571_v47  ;;  %v733_v49 = vpop.f32.mrf.mxu2  ;;  %v637_v51 = vpop.f32.mrf.mxu0 }
 0x104   : > { %v782_v50 = vpop.f32.mrf.mxu3  ;;  %v638_v53 = vadd.f32 %v637_v51, %v1553_v34  ;;  %v686_v55 = vpop.f32.mrf.mxu1  ;;  %v734_v62 = vadd.f32 %v733_v49, %v398_v52 }
 0x105   : > { %v687_v58 = vadd.f32 %v686_v55, %v1553_v34  ;;  %v783_v0 = vadd.f32 %v782_v50, %v398_v52 }
 0x106   : > { %v832_v59 = vmax.f32 %v638_v53, 0.0  ;;  %v830_v9 = vmax.f32 %v734_v62, 0.0 }
 0x107   : > { %v833_v60 = vmax.f32 %v687_v58, 0.0  ;;  %v831_v11 = vmax.f32 %v783_v0, 0.0 }
 0x108   : > { %v1575_v61 = vpack.c.bf16 %v832_v59, %v828_v35 }
 0x109   : > { %v1577_v63 = vpack.c.bf16 %v833_v60, %v829_v57 }
 0x10b   : > { %v735_v1 = vpop.f32.mrf.mxu2  ;;  %v640_v5 = vpop.f32.mrf.mxu0 }
 0x10c   : > { %v736_v2 = vadd.f32 %v735_v1, %v1553_v34  ;;  %v784_v3 = vpop.f32.mrf.mxu3  ;;  %v689_v8 = vpop.f32.mrf.mxu1  ;;  %v641_v14 = vadd.f32 %v640_v5, %v1543_v31 }
 0x10d   : > { %v785_v7 = vadd.f32 %v784_v3, %v1553_v34  ;;  %v690_v52 = vadd.f32 %v689_v8, %v1543_v31 }
 0x10e   : > { %v834_v10 = vmax.f32 %v736_v2, 0.0  ;;  %v836_v20 = vmax.f32 %v641_v14, 0.0 }
 0x10f   : > { %v835_v12 = vmax.f32 %v785_v7, 0.0  ;;  %v837_v26 = vmax.f32 %v690_v52, 0.0 }
 0x110   : > { %v1581_v13 = vpack.c.bf16 %v834_v10, %v830_v9 }
 0x111   : > { %v1584_v15 = vpack.c.bf16 %v835_v12, %v831_v11 }
 0x113   : > { %v738_v16 = vpop.f32.mrf.mxu2  ;;  %v642_v18 = vpop.f32.mrf.mxu0 }
 0x114   : > { %v787_v17 = vpop.f32.mrf.mxu3  ;;  %v643_v22 = vadd.f32 %v642_v18, %v1545_v32  ;;  %v691_v34 = vpop.f32.mrf.mxu1  ;;  %v739_v40 = vadd.f32 %v738_v16, %v1543_v31 }
 0x115   : > { %v692_v30 = vadd.f32 %v691_v34, %v1545_v32  ;;  %v788_v42 = vadd.f32 %v787_v17, %v1543_v31 }
 0x116   : > { %v840_v36 = vmax.f32 %v643_v22, 0.0  ;;  %v838_v51 = vmax.f32 %v739_v40, 0.0 }
 0x117   : > { %v841_v37 = vmax.f32 %v692_v30, 0.0  ;;  %v839_v53 = vmax.f32 %v788_v42, 0.0 }
 0x118   : > { %v1589_v39 = vpack.c.bf16 %v840_v36, %v836_v20 }
 0x119   : > { %v1592_v41 = vpack.c.bf16 %v841_v37, %v837_v26 }
 0x11b   : > { %v740_v43 = vpop.f32.mrf.mxu2  ;;  %v645_v48 = vpop.f32.mrf.mxu0 }
 0x11c   : > { %v741_v44 = vadd.f32 %v740_v43, %v1545_v32  ;;  %v789_v46 = vpop.f32.mrf.mxu3  ;;  %v694_v50 = vpop.f32.mrf.mxu1  ;;  %v1618_v26 = vadd.f32 %v645_v48, %v1536_v28 }
 0x11d   : > { %v790_v49 = vadd.f32 %v789_v46, %v1545_v32 }
 0x11e   : > { %v842_v35 = vmax.f32 %v741_v44, 0.0 }
 0x11f   : > { %v843_v55 = vmax.f32 %v790_v49, 0.0 }
 0x120   : > { %v1597_v57 = vpack.c.bf16 %v842_v35, %v838_v51  ;;  %v1626_v51 = vadd.f32 %v694_v50, %v1536_v28 }
 0x121   : > { %v1599_v58 = vpack.c.bf16 %v843_v55, %v839_v53 }
 0x123   : > { %v1601_v59 = vpop.f32.mrf.mxu2  ;;  %v647_v31 = vpop.f32.mrf.mxu0 }
 0x124   : > { %v1603_v60 = vpop.f32.mrf.mxu3  ;;  %v696_v62 = vpop.f32.mrf.mxu1 }
 0x12b   : > { %v1605_v0 = vpop.f32.mrf.mxu2  ;;  %v650_v32 = vpop.f32.mrf.mxu0 }
 0x12c   : > { %v1607_v1 = vpop.f32.mrf.mxu3  ;;  %v699_v2 = vpop.f32.mrf.mxu1 }
 0x133   : > { %v1609_v3 = vpop.f32.mrf.mxu2  ;;  %v652_v7 = vpop.f32.mrf.mxu0 }
 0x134   : > { %v1611_v5 = vpop.f32.mrf.mxu3  ;;  %v701_v8 = vpop.f32.mrf.mxu1 }
 0x135   : > { %v702_v50 = vadd.f32 %v701_v8, %v1534_v27 }
 0x13b   : > { %v1613_v9 = vpop.f32.mrf.mxu2  ;;  %v655_v11 = vpop.f32.mrf.mxu0 }
 0x13c   : > { %v1615_v10 = vpop.f32.mrf.mxu3  ;;  %v704_v12 = vpop.f32.mrf.mxu1  ;;  %v656_v43 = vadd.f32 %v655_v11, %v1538_v29 }
 0x13d   : > { %v705_v48 = vadd.f32 %v704_v12, %v1538_v29 }
 0x13e   : > { %v860_v47 = vmax.f32 %v656_v43, 0.0 }
 0x143   : > { %v753_v14 = vpop.f32.mrf.mxu2  ;;  %v657_v16 = vpop.f32.mrf.mxu0 }
 0x144   : > { %v802_v52 = vpop.f32.mrf.mxu3  ;;  %v706_v17 = vpop.f32.mrf.mxu1  ;;  %v658_v44 = vadd.f32 %v657_v16, %v1551_v33  ;;  %v700_v16 = vadd.f32 %v699_v2, %v1523_v24 }
 0x145   : > { %v707_v35 = vadd.f32 %v706_v17, %v1551_v33  ;;  %v861_v17 = vmax.f32 %v705_v48, 0.0  ;;  %v857_v48 = vmax.f32 %v702_v50, 0.0  ;;  %v795_v50 = vadd.f32 %v1607_v1, %v1555_v38 }
 0x146   : > { %v864_v12 = vmax.f32 %v658_v44, 0.0 }
 0x147   : > { %v865_v56 = vmax.f32 %v707_v35, 0.0  ;;  %v803_v35 = vadd.f32 %v802_v52, %v1538_v29  ;;  %v851_v1 = vmax.f32 %v795_v50, 0.0 }
 0x14b   : > { %v755_v18 = vpop.f32.mrf.mxu2  ;;  %v660_v22 = vpop.f32.mrf.mxu0 }
 0x14c   : > { %v804_v20 = vpop.f32.mrf.mxu3  ;;  %v709_v34 = vpop.f32.mrf.mxu1  ;;  %v661_v30 = vadd.f32 %v660_v22, %v1520_v23  ;;  %v651_v22 = vadd.f32 %v650_v32, %v1523_v24  ;;  %v648_v32 = vadd.f32 %v647_v31, %v1555_v38  ;;  %v756_v8 = vadd.f32 %v755_v18, %v1551_v33 }
 0x14d   : > { %v710_v37 = vadd.f32 %v709_v34, %v1520_v23  ;;  %v901_v31 = vpack.c.bf16 %v864_v12, %v860_v47  ;;  %v800_v47 = vadd.f32 %v1615_v10, %v1534_v27 }
 0x14e   : > { %v868_v34 = vmax.f32 %v661_v30, 0.0  ;;  %v697_v30 = vadd.f32 %v696_v62, %v1555_v38  ;;  %v754_v62 = vadd.f32 %v753_v14, %v1538_v29  ;;  %v749_v29 = vadd.f32 %v1609_v3, %v1523_v24 }
 0x14f   : > { %v869_v6 = vmax.f32 %v710_v37, 0.0  ;;  %v853_v37 = vmax.f32 %v700_v16, 0.0  ;;  %v798_v16 = vadd.f32 %v1611_v5, %v1523_v24  ;;  %v859_v12 = vmax.f32 %v800_v47, 0.0 }
 0x150   : > { %v862_v52 = vmax.f32 %v754_v62, 0.0  ;;  %v744_v24 = vadd.f32 %v1601_v59, %v1536_v28  ;;  %v854_v5 = vmax.f32 %v749_v29, 0.0 }
 0x153   : > { %v758_v36 = vpop.f32.mrf.mxu2  ;;  %v662_v42 = vpop.f32.mrf.mxu0 }
 0x154   : > { %v807_v40 = vpop.f32.mrf.mxu3  ;;  %v663_v46 = vadd.f32 %v662_v42, %v1525_v25  ;;  %v711_v49 = vpop.f32.mrf.mxu1  ;;  %v653_v42 = vadd.f32 %v652_v7, %v1534_v27 }
 0x155   : > { %v712_v53 = vadd.f32 %v711_v49, %v1525_v25  ;;  %v759_v49 = vadd.f32 %v758_v36, %v1520_v23  ;;  %v808_v2 = vadd.f32 %v807_v40, %v1520_v23  ;;  %v902_v40 = vpack.c.bf16 %v865_v56, %v861_v17 }
 0x156   : > { %v872_v11 = vmax.f32 %v663_v46, 0.0  ;;  %v852_v46 = vmax.f32 %v651_v22, 0.0  ;;  %v1733_v17 = vmax.f32 %v1618_v26, 0.0 }
 0x157   : > { %v873_v4 = vmax.f32 %v712_v53, 0.0  ;;  %v856_v53 = vmax.f32 %v653_v42, 0.0  ;;  %v870_v36 = vmax.f32 %v759_v49, 0.0  ;;  %v871_v18 = vmax.f32 %v808_v2, 0.0 }
 0x158   : > { %v905_v45 = vpack.c.bf16 %v872_v11, %v868_v34  ;;  %v848_v34 = vmax.f32 %v648_v32, 0.0  ;;  %v849_v11 = vmax.f32 %v697_v30, 0.0  ;;  %v746_v42 = vadd.f32 %v1605_v0, %v1555_v38 }
 0x159   : > { %v906_v55 = vpack.c.bf16 %v873_v4, %v869_v6  ;;  %v805_v4 = vadd.f32 %v804_v20, %v1551_v33  ;;  %v866_v33 = vmax.f32 %v756_v8, 0.0  ;;  %v897_v56 = vpack.c.bf16 %v856_v53, %v852_v46 }
 0x15a   : > { %911 = vmatpush.bf16.msrb.mxu0 %v905_v45  ;;  %v845_v45 = vmax.f32 %v1626_v51, 0.0  ;;  %v898_v51 = vpack.c.bf16 %v857_v48, %v853_v37  ;;  %v893_v49 = vpack.c.bf16 %v848_v34, %v1733_v17  ;;  %v793_v0 = vadd.f32 %v1603_v60, %v1536_v28  ;;  %v876_v28 = vld [vmem:[%s1723_s3] sm:$0x1] }
 0x15b   : > { %v760_v7 = vpop.f32.mrf.mxu2  ;;  %924 = vmatpush.bf16.msrb.mxu1 %v906_v55  ;;  %v751_v55 = vadd.f32 %v1613_v9, %v1534_v27  ;;  %v867_v14 = vmax.f32 %v805_v4, 0.0  ;;  %v863_v9 = vmax.f32 %v803_v35, 0.0  ;;  %v903_v10 = vpack.c.bf16 %v866_v33, %v862_v52 }
 0x15c   : > { %v761_v43 = vadd.f32 %v760_v7, %v1525_v25  ;;  %v809_v44 = vpop.f32.mrf.mxu3  ;;  %v894_v32 = vpack.c.bf16 %v849_v11, %v845_v45  ;;  %v855_v30 = vmax.f32 %v798_v16, 0.0  ;;  %v850_v46 = vmax.f32 %v746_v42, 0.0 }
 0x15d   : > { %v810_v6 = vadd.f32 %v809_v44, %v1525_v25  ;;  %v858_v27 = vmax.f32 %v751_v55, 0.0  ;;  %v904_v3 = vpack.c.bf16 %v867_v14, %v863_v9  ;;  %v846_v7 = vmax.f32 %v744_v24, 0.0 }
 0x15e   : > { %v874_v23 = vmax.f32 %v761_v43, 0.0  ;;  %912 = vmatpush.bf16.msrb.mxu0 %v901_v31  ;;  %v900_v2 = vpack.c.bf16 %v859_v12, %v855_v30  ;;  %v847_v26 = vmax.f32 %v793_v0, 0.0  ;;  %v977_v43 = vlaneseq }
 0x15f   : > { %v875_v22 = vmax.f32 %v810_v6, 0.0  ;;  %925 = vmatpush.bf16.msrb.mxu1 %v902_v40  ;;  %v899_v38 = vpack.c.bf16 %v858_v27, %v854_v5  ;;  %v895_v59 = vpack.c.bf16 %v850_v46, %v846_v7 }
 0x160   : > { %v907_v25 = vpack.c.bf16 %v874_v23, %v870_v36  ;;  %v896_v37 = vpack.c.bf16 %v851_v1, %v847_v26  ;;  %vm979_vm4 = vcmp.lt.s32.totalorder %v977_v43, 512 }
 0x161   : > { %v908_v20 = vpack.c.bf16 %v875_v22, %v871_v18 }
 0x162   : > { %937 = vmatpush.bf16.msrb.mxu2 %v907_v25  ;;  %913 = vmatpush.bf16.msrb.mxu0 %v897_v56 }
 0x163   : > { %950 = vmatpush.bf16.msrb.mxu3 %v908_v20  ;;  %926 = vmatpush.bf16.msrb.mxu1 %v898_v51 }
 0x166   : > { %938 = vmatpush.bf16.msrb.mxu2 %v903_v10  ;;  %914 = vmatpush.bf16.msrb.mxu0 %v893_v49 }
 0x167   : > { %951 = vmatpush.bf16.msrb.mxu3 %v904_v3  ;;  %927 = vmatpush.bf16.msrb.mxu1 %v894_v32 }
 0x16a   : > { %939 = vmatpush.bf16.msrb.mxu2 %v899_v38  ;;  %915 = vmatpush.bf16.msrb.mxu0 %v1589_v39  ;;  %v910_v39 = vstv %s909_s11 }
 0x16b   : > { %952 = vmatpush.bf16.msrb.mxu3 %v900_v2  ;;  %928 = vmatpush.bf16.msrb.mxu1 %v1592_v41 }
 0x16e   : > { %940 = vmatpush.bf16.msrb.mxu2 %v895_v59  ;;  %916 = vmatpush.bf16.msrb.mxu0 %v1575_v61  ;;  %v1734_v61 = vld [vmem:[#allocation6_spill] sm:$0xff] }
 0x16f   : > { %953 = vmatpush.bf16.msrb.mxu3 %v896_v37  ;;  %929 = vmatpush.bf16.msrb.mxu1 %v1577_v63  ;;  %v1735_v63 = vld [vmem:[#allocation9_spill] sm:$0xff] }
 0x172   : > { %941 = vmatpush.bf16.msrb.mxu2 %v1597_v57  ;;  %917 = vmatpush.bf16.msrb.mxu0 %v1565_v19  ;;  %v1736_v19 = vld [vmem:[#allocation10_spill] sm:$0xff] }
 0x173   : > { %954 = vmatpush.bf16.msrb.mxu3 %v1599_v58  ;;  %930 = vmatpush.bf16.msrb.mxu1 %v1567_v21  ;;  %v1737_v21 = vld [vmem:[#allocation7_spill] sm:$0xff] }
 0x176   : > { %942 = vmatpush.bf16.msrb.mxu2 %v1581_v13  ;;  %918 = vmatpush.bf16.msrb.mxu0 %v1557_v54  ;;  %v1738_v13 = vld [vmem:[#allocation8_spill] sm:$0xff] }
 0x177   : > { %955 = vmatpush.bf16.msrb.mxu3 %v1584_v15  ;;  %931 = vmatpush.bf16.msrb.mxu1 %v1734_v61 }
 0x179   : > { %919 = vmatmul.bf16.vlgmr.msrb.gmra.mxu0 %v876_v28 }
 0x17a   : > { %943 = vmatpush.bf16.msrb.mxu2 %v1735_v63  ;;  %932 = vmatmul.bf16.vlgmr.msrb.gmra.mxu1 %v876_v28 }
 0x17b   : > { %956 = vmatpush.bf16.msrb.mxu3 %v1736_v19 }
 0x17e   : > { %944 = vmatpush.bf16.msrb.mxu2 %v1737_v21 }
 0x17f   : > { %957 = vmatpush.bf16.msrb.mxu3 %v1738_v13 }
 0x181   : > { %945 = vmatmul.bf16.vlgmr.msrb.gmra.mxu2 %v876_v28 }
 0x182   : > { %958 = vmatmul.bf16.vlgmr.msrb.gmra.mxu3 %v876_v28 }
 0x1f6   : > { %v920_v54 = vpop.f32.mrf.mxu0 }
 0x1f7   : > { %v933_v15 = vpop.f32.mrf.mxu1  ;;  %v921_v44 = vadd.f32 %v920_v54, %v910_v39 }
 0x1f8   : > { %v934_v58 = vadd.f32 %v933_v15, %v910_v39 }
 0x1fa   : > { %v967_v48 = vrot.slane %v934_v58, 7 }
 0x1fc   : > { %v971_v62 = vsel %vm970_vm1, %v921_v44, %v967_v48 }
 0x1fe   : > { %v922_v41 = vpop.f32.mrf.mxu0 }
 0x1ff   : > { %v935_v57 = vpop.f32.mrf.mxu1 }
 0x204   : > { %v946_v60 = vpop.f32.mrf.mxu2 }
 0x205   : > { %v947_v53 = vadd.f32 %v946_v60, %v910_v39  ;;  %v959_v8 = vpop.f32.mrf.mxu3 }
 0x206   : > { %v960_v4 = vadd.f32 %v959_v8, %v910_v39 }
 0x207   : > { %v968_v6 = vrot.slane %v947_v53, 6 }
 0x208   : > { %v969_v31 = vrot.slane %v960_v4, 5 }
 0x20a   : > { %v973_v36 = vsel %vm972_vm2, %v968_v6, %v969_v31 }
 0x20b   : > { %v975_v23 = vsel %vm974_vm3, %v971_v62, %v973_v36 }
 0x20c   : > { %v948_v40 = vpop.f32.mrf.mxu2  ;;  %981 = vst.msk [vmem:[%s231_s17] sm:$0xf] %vm979_vm4, %v975_v23 }
 0x20d   : > { %v961_v45 = vpop.f32.mrf.mxu3 }
 0x20e   : > { %1210 = shalt.err (!%p1207_p3)
}
 0x20f   : > { %1140 = dma.vmem_to_hbm [thread:$0]  (%p1319_p5), %s996_s18, 64, %s998_s19, %s983_s4  }
 0x210 PF: > { %p1146_p4 = scmp.ge.s32.totalorder %s1245_s23, 2  ;;  %s1009_s11 = sand.u32 1, %s1233_s20  }
 0x211   : > { %s1010_s12 = scalar_lea.sflag [#allocation4], %s1009_s11 }
 0x212   : > { %p1143_p7 = pnand %p1146_p4, %p1323_p6 }
 0x214   : > { %p1144_p8 = pneg %p1143_p7 }
 0x216   : > { %1228 = dma.done.wait (%p1144_p8), %s1010_s12, 64  }
 0x217   : > { %1230 = vsyncadd (%p1144_p8), %s1010_s12, 4294967232  ;;  %p16_p9 = scmp.ge.s32.totalorder %s1306_s25, 4   ;;  %s1739_s20 = smov %s1237_s21 }
 0x218   : > { %s1740_s21 = smov %s1241_s22  ;;  %s1741_s22 = smov %s1317_s28 }
 0x219   : > { %s1742_s23 = smov %s1306_s25  ;;  %18 = sbr.rel (!%p16_p9) target bundleno = 5 (0x5), region = 75 }
 0x21e   :  { %1016 = vsyncpa [#allocation4], 1 }
 0x21f   :  { %1018 = vsyncpa [#allocation4 + $0x1], 1 }

</bundles_post_ra>
